<compile_context>
chip_gen: v7x
topology: tpu7x:2x2x1
jax: 0.10.0
libtpu: 0.0.40
codegen_flags: <defaults>
</compile_context>

<pallas_src>
import functools

import jax
import jax.numpy as jnp
from jax import lax
from jax.experimental import pallas as pl
from jax.experimental.pallas import tpu as pltpu


_NEG_INF = -1e30  # large finite negative: avoids any inf-inf edge cases


def _round_up(x, m):
    return ((x + m - 1) // m) * m


def _head_kernel(seed_ref, x_ref, w_ref, o_ref, *,
                 hp, scale, dropout_p, training, compute_dtype, approx_recip):
    """One grid step == one block of `Bb` batch elements.

    x_ref: (Bb, T, C)   w_ref: (C, 3*hp)  columns = [k | q | v], each padded
    o_ref: (Bb, T, hp)
    """
    bb, t, c = x_ref.shape

    # --- fused QKV projection: one wide MXU pass -------------------------
    # (Bb, T, C) -> (Bb*T, C) is layout-trivial when T % 8 == 0 (typical).
    x2d = x_ref[...].reshape(bb * t, c)
    proj = jnp.dot(x2d, w_ref[...],
                   preferred_element_type=jnp.float32)        # (Bb*T, 3*hp) f32
    proj = proj.reshape(bb, t, 3 * hp)

    # Lane-aligned (multiple-of-128) static slices; padded columns are zero.
    k = proj[:, :, 0 * hp:1 * hp].astype(compute_dtype)
    q = (proj[:, :, 1 * hp:2 * hp] * scale).astype(compute_dtype)  # fold scale
    v = proj[:, :, 2 * hp:3 * hp].astype(compute_dtype)

    # --- scores: batched contraction on the last axes (no k.T copy) ------
    wei = lax.dot_general(q, k,
                          dimension_numbers=(((2,), (2,)), ((0,), (0,))),
                          preferred_element_type=jnp.float32)      # (Bb, T, T)

    # Causal mask == tril[:T, :T] (zero-padded k columns never perturb wei).
    row = lax.broadcasted_iota(jnp.int32, (bb, t, t), 1)
    col = lax.broadcasted_iota(jnp.int32, (bb, t, t), 2)
    wei = jnp.where(col <= row, wei, _NEG_INF)

    # --- softmax in f32; exp + reciprocal ride the EUP slot ---------------
    wei = wei - jnp.max(wei, axis=-1, keepdims=True)
    p = jnp.exp(wei)
    denom = jnp.sum(p, axis=-1, keepdims=True)
    p = p * pl.reciprocal(denom, approx=approx_recip)

    # --- dropout on the attention weights (training mode only) -----------
    # TODO(synk): RNG stream differs from torch.nn.Dropout; semantics
    # (drop with prob p, rescale kept by 1/(1-p)) are preserved.
    if training and dropout_p > 0.0:
        pltpu.prng_seed(seed_ref[0] + pl.program_id(0))
        bits = pltpu.prng_random_bits((bb, t, t))
        if bits.dtype != jnp.uint32:
            bits = pltpu.bitcast(bits, jnp.uint32)
        thr = jnp.uint32(min(int(dropout_p * 4294967296.0), 4294967295))
        keep = bits >= thr                         # P(drop) == dropout_p
        p = jnp.where(keep, p * (1.0 / (1.0 - dropout_p)), 0.0)

    # --- weighted sum of values; lane-dense (hp-wide) output store -------
    out = lax.dot_general(p.astype(compute_dtype), v,
                          dimension_numbers=(((2,), (1,)), ((0,), (0,))),
                          preferred_element_type=jnp.float32)      # (Bb, T, hp)
    o_ref[...] = out.astype(o_ref.dtype)


def _pick_batch_block(batch, t):
    """Batch elements per grid step.

    Big enough to amortize the ~0.35us/step pipeline cost and fill sublanes,
    but keep >=2 grid steps when the batch allows it so v7x's two TensorCores
    both get work (grid axis 0 is marked "parallel").
    """
    target = max(1, 256 // max(t, 1))              # aim for ~256 rows per step
    divisors = [d for d in range(1, batch + 1) if batch % d == 0]
    bb = max([d for d in divisors if d <= target], default=1)
    while bb > 1 and batch // bb < 2:
        bb = max(d for d in divisors if d < bb)
    return bb


def head_forward(x, w_key, w_query, w_value, *, dropout_p=0.1, training=False,
                 seed=0, compute_dtype=jnp.bfloat16, batch_block=None):
    """x: (B, T, C); w_*: (C, H) (already-transposed nn.Linear weights)."""
    B, T, C = x.shape
    H = w_key.shape[1]
    scale = float(C) ** -0.5                       # matches the module: C**-0.5

    # Pad every projection to a lane-aligned width; padded columns are zero,
    # only feed padded output columns, and are sliced away below.
    hp = _round_up(H, 128)

    def _pad(w):
        return w if hp == H else jnp.pad(w, ((0, 0), (0, hp - H)))

    w_fused = jnp.concatenate([_pad(w_key), _pad(w_query), _pad(w_value)],
                              axis=1).astype(compute_dtype)        # (C, 3*hp)
    x_c = x.astype(compute_dtype)

    bb = batch_block if batch_block is not None else _pick_batch_block(B, T)
    assert B % bb == 0, "batch_block must divide the batch size"
    grid = (B // bb,)

    use_bf16 = jnp.dtype(compute_dtype) == jnp.dtype(jnp.bfloat16)
    kernel = functools.partial(
        _head_kernel, hp=hp, scale=scale, dropout_p=dropout_p,
        training=training, compute_dtype=compute_dtype,
        approx_recip=bool(use_bf16))

    seed_arr = jnp.asarray([seed], dtype=jnp.int32)

    grid_spec = pltpu.PrefetchScalarGridSpec(
        num_scalar_prefetch=1,
        grid=grid,
        in_specs=[
            pl.BlockSpec((bb, T, C), lambda b, *_: (b, 0, 0)),       # x
            pl.BlockSpec((C, 3 * hp), lambda b, *_: (0, 0)),         # fused W
        ],
        out_specs=pl.BlockSpec((bb, T, hp), lambda b, *_: (b, 0, 0)),
    )

    # TODO(synk): for production sequence lengths (T >= ~2k) tile the kv axis
    # flash-style (online softmax, grid (B, T//tq, T//tk), reduction axis last
    # and "arbitrary") so the full (T, T) score matrix never materializes;
    # this is mandatory on v7x (64 MiB physical VMEM).
    out_padded = pl.pallas_call(
        kernel,
        out_shape=jax.ShapeDtypeStruct((B, T, hp), x.dtype),
        grid_spec=grid_spec,
        compiler_params=pltpu.CompilerParams(
            dimension_semantics=("parallel",)),
    )(seed_arr, x_c, w_fused)

    return out_padded if hp == H else out_padded[:, :, :H]


def head_reference(x, w_key, w_query, w_value):
    """Pure-JAX reference for the eval-mode (no dropout) forward."""
    B, T, C = x.shape
    k = x @ w_key
    q = x @ w_query
    v = x @ w_value
    wei = (q @ jnp.swapaxes(k, -2, -1)) * (float(C) ** -0.5)
    mask = jnp.tril(jnp.ones((T, T), dtype=bool))
    wei = jnp.where(mask[None], wei, -jnp.inf)
    wei = jax.nn.softmax(wei, axis=-1)
    return wei @ v


if __name__ == "__main__":
    # Small shapes consistent with the module: B=2, T=block_size=8, C=32, H=16.
    B, T, C, H = 2, 8, 32, 16

    key = jax.random.PRNGKey(0)
    kx, kk, kq, kv = jax.random.split(key, 4)
    x = jax.random.normal(kx, (B, T, C), dtype=jnp.float32)
    # Deterministic "nn.Linear" weights, stored pre-transposed as (C, H).
    w_key = jax.random.normal(kk, (C, H), dtype=jnp.float32) * (C ** -0.5)
    w_query = jax.random.normal(kq, (C, H), dtype=jnp.float32) * (C ** -0.5)
    w_value = jax.random.normal(kv, (C, H), dtype=jnp.float32) * (C ** -0.5)

    ref = head_reference(x, w_key, w_query, w_value)

    # f32-compute path (tighter check).
    out_f32 = head_forward(x, w_key, w_query, w_value, training=False,
                           compute_dtype=jnp.float32)
    out_f32 = jax.block_until_ready(out_f32)
    assert out_f32.shape == (B, T, H)
    assert jnp.allclose(out_f32, ref, atol=2e-2, rtol=2e-2), "f32 mismatch"

    # bf16-compute path (default / recommended perf config; looser check).
    out_bf16 = head_forward(x, w_key, w_query, w_value, training=False,
                            compute_dtype=jnp.bfloat16)
    out_bf16 = jax.block_until_ready(out_bf16)
    assert out_bf16.shape == (B, T, H)
    assert jnp.allclose(out_bf16, ref, atol=7e-2, rtol=7e-2), "bf16 mismatch"

    print("KERNEL_OK")
</pallas_src>

<mosaic_0001>
module attributes {stable_mosaic.version = 11 : i64} {
  func.func @_head_kernel(%arg0: i32, %arg1: memref<1xi32, #tpu.memory_space<smem>>, %arg2: memref<1x8x32xf32, #tpu.memory_space<vmem>>, %arg3: memref<32x384xf32, #tpu.memory_space<vmem>>, %arg4: memref<1x8x128xf32, #tpu.memory_space<vmem>>) attributes {dimension_semantics = [#tpu.dimension_semantics<parallel>], iteration_bounds = array<i64: 2>, scalar_prefetch = 1 : i64, scratch_operands = 0 : i64, tpu.core_type = #tpu.core_type<tc>, window_params = [{transform_indices = @transform_0, window_bounds = array<i64: 1, 8, 32>}, {pipeline_mode = #tpu.pipeline_mode<synchronous>, transform_indices = @transform_1, window_bounds = array<i64: 32, 384>}, {transform_indices = @transform_2, window_bounds = array<i64: 1, 8, 128>}]} {
    %c0 = arith.constant 0 : index
    %c0_0 = arith.constant 0 : index
    %c0_1 = arith.constant 0 : index
    %0 = vector.load %arg2[%c0, %c0_0, %c0_1] : memref<1x8x32xf32, #tpu.memory_space<vmem>>, vector<1x8x32xf32>
    %1 = vector.shape_cast %0 : vector<1x8x32xf32> to vector<8x32xf32>
    %c0_2 = arith.constant 0 : index
    %c0_3 = arith.constant 0 : index
    %2 = vector.load %arg3[%c0_2, %c0_3] : memref<32x384xf32, #tpu.memory_space<vmem>>, vector<32x384xf32>
    %cst = arith.constant dense<0.000000e+00> : vector<8x384xf32>
    %3 = tpu.matmul %1, %2, %cst {dimension_numbers = #tpu.dot_dimension_numbers<[1], [0], [0], [1], [0, 0, 1, 1], [], []>} : vector<8x32xf32>, vector<32x384xf32>, vector<8x384xf32> -> vector<8x384xf32>
    %4 = vector.shape_cast %3 : vector<8x384xf32> to vector<1x8x384xf32>
    %5 = vector.extract_strided_slice %4 {offsets = [0, 0, 0], sizes = [1, 8, 128], strides = [1, 1, 1]} : vector<1x8x384xf32> to vector<1x8x128xf32>
    %6 = vector.extract_strided_slice %4 {offsets = [0, 0, 128], sizes = [1, 8, 128], strides = [1, 1, 1]} : vector<1x8x384xf32> to vector<1x8x128xf32>
    %cst_4 = arith.constant 0.176776692 : f32
    %7 = vector.broadcast %cst_4 : f32 to vector<1x8x128xf32>
    %8 = arith.mulf %6, %7 : vector<1x8x128xf32>
    %9 = vector.extract_strided_slice %4 {offsets = [0, 0, 256], sizes = [1, 8, 128], strides = [1, 1, 1]} : vector<1x8x384xf32> to vector<1x8x128xf32>
    %cst_5 = arith.constant dense<0.000000e+00> : vector<1x8x8xf32>
    %10 = tpu.matmul %8, %5, %cst_5 {dimension_numbers = #tpu.dot_dimension_numbers<[2], [2], [1], [1], [0, 0, 0, 1, 1, 1], [0], [0]>} : vector<1x8x128xf32>, vector<1x8x128xf32>, vector<1x8x8xf32> -> vector<1x8x8xf32>
    %11 = tpu.iota {dimensions = array<i32: 1>} : vector<1x8x8xi32>
    %12 = tpu.iota {dimensions = array<i32: 2>} : vector<1x8x8xi32>
    %13 = arith.cmpi sle, %12, %11 : vector<1x8x8xi32>
    %cst_6 = arith.constant -1.000000e+30 : f32
    %14 = vector.broadcast %cst_6 : f32 to vector<1x8x8xf32>
    %15 = arith.select %13, %10, %14 : vector<1x8x8xi1>, vector<1x8x8xf32>
    %cst_7 = arith.constant dense<0xFF800000> : vector<1x8xf32>
    %16 = vector.multi_reduction <maximumf>, %15, %cst_7 [2] : vector<1x8x8xf32> to vector<1x8xf32>
    %17 = vector.shape_cast %16 : vector<1x8xf32> to vector<1x8x1xf32>
    %18 = vector.broadcast %17 : vector<1x8x1xf32> to vector<1x8x8xf32>
    %19 = arith.subf %15, %18 : vector<1x8x8xf32>
    %20 = math.exp %19 : vector<1x8x8xf32>
    %cst_8 = arith.constant dense<0.000000e+00> : vector<1x8xf32>
    %21 = vector.multi_reduction <add>, %20, %cst_8 [2] : vector<1x8x8xf32> to vector<1x8xf32>
    %22 = vector.shape_cast %21 : vector<1x8xf32> to vector<1x8x1xf32>
    %23 = tpu.reciprocal %22 : vector<1x8x1xf32> -> vector<1x8x1xf32>
    %24 = vector.broadcast %23 : vector<1x8x1xf32> to vector<1x8x8xf32>
    %25 = arith.mulf %20, %24 : vector<1x8x8xf32>
    %cst_9 = arith.constant dense<0.000000e+00> : vector<1x8x128xf32>
    %26 = tpu.matmul %25, %9, %cst_9 {dimension_numbers = #tpu.dot_dimension_numbers<[2], [1], [1], [2], [0, 0, 0, 1, 1, 2], [0], [0]>} : vector<1x8x8xf32>, vector<1x8x128xf32>, vector<1x8x128xf32> -> vector<1x8x128xf32>
    %c0_10 = arith.constant 0 : index
    %c0_11 = arith.constant 0 : index
    %c0_12 = arith.constant 0 : index
    %27 = vector.load %arg4[%c0_10, %c0_11, %c0_12] : memref<1x8x128xf32, #tpu.memory_space<vmem>>, vector<1x8x128xf32>
    tpu.vector_store %arg4[%c0_10, %c0_11, %c0_12], %26 {strides = array<i32>} : memref<1x8x128xf32, #tpu.memory_space<vmem>>, vector<1x8x128xf32>,
    return
  }
  func.func @transform_0(%arg0: i32, %arg1: memref<1xi32, #tpu.memory_space<smem>>) -> (i32, i32, i32) {
    %c0_i32 = arith.constant 0 : i32
    %c0_i32_0 = arith.constant 0 : i32
    %c0_i32_1 = arith.constant 0 : i32
    return %arg0, %c0_i32, %c0_i32_0 : i32, i32, i32
  }
  func.func @transform_1(%arg0: i32, %arg1: memref<1xi32, #tpu.memory_space<smem>>) -> (i32, i32) {
    %c0_i32 = arith.constant 0 : i32
    %c0_i32_0 = arith.constant 0 : i32
    %c0_i32_1 = arith.constant 0 : i32
    return %c0_i32, %c0_i32_0 : i32, i32
  }
  func.func @transform_2(%arg0: i32, %arg1: memref<1xi32, #tpu.memory_space<smem>>) -> (i32, i32, i32) {
    %c0_i32 = arith.constant 0 : i32
    %c0_i32_0 = arith.constant 0 : i32
    %c0_i32_1 = arith.constant 0 : i32
    return %arg0, %c0_i32, %c0_i32_0 : i32, i32, i32
  }
}

</mosaic_0001>

<bundles_post_ra>
// kernel: tpu_custom_call.1
= control target key start
LH: loop header
LB: loop body
LE: loop exit
PB: predicated region body
PF: predicated region fallthrough
CT: control target
= control target key end

     0   :  { %9 = vsyncpa [#allocation5], 0  ;;  %s1084_s0 = inlined_call_operand.<no memory space> [shape: s32[1], index: 0, kind: input, shape index: {}]   ;;  %s1085_s1 = inlined_call_operand.hbm [shape: f32[2,8,32], index: 1, kind: input, shape index: {}]   ;;  %s1086_s2 = inlined_call_operand.hbm [shape: f32[32,384], index: 2, kind: input, shape index: {}]   ;;  %s1087_s3 = inlined_call_operand.hbm [shape: f32[2,8,128], index: 3, kind: output, shape index: {}]  }
   0x1   :  { %11 = vsyncpa [#allocation5 + $0x1], 0 }
   0x2   :  { %12 = vsyncpa [#allocation8], 0 }
   0x3   :  { %13 = vsyncpa [#allocation6], 0 }
   0x4   :  { %15 = vsyncpa [#allocation6 + $0x1], 0  ;;  %s876_s12 = smov 0   ;;  %s878_s13 = smov 0  }
   0x5   :  { %s880_s14 = smov 0   ;;  %s882_s0 = smov 0  }
   0x6 LB: > { %s897_s15 = sadd.s32 4294967295, %s846_s0   ;;  %s591_s16 = sadd.s32 4294967294, %s846_s0   ;;  %s846_s0 = sphi %s882_s0, %s1107_s0   ;;  %s842_s14 = sphi %s880_s14, %s1106_s14   ;;  %s838_s13 = sphi %s878_s13, %s1105_s13   ;;  %s834_s12 = sphi %s876_s12, %s1104_s12  }
   0x7   : > { %p41_p0 = scmp.ne.s32.totalorder %s838_s13, %s834_s12  ;;  %p1088_p1 = scmp.eq.s32.totalorder %s897_s15, 0 }
   0x8   : > { %p92_p3 = scmp.eq.s32.totalorder %s591_s16, 1  ;;  %p592_p5 = scmp.ge.s32.totalorder %s846_s0, 1 }
   0x9   : > { %p906_p4 = por %p1088_p1, %p41_p0  ;;  %p99_p7 = scmp.lt.s32.totalorder %s846_s0, 3 }
   0xa   : > { %p911_p6 = por %p92_p3, %p41_p0  ;;  %s848_s20 = smov [#allocation7]  }
   0xb   : > { %s1091_s17 = scalar_select %p906_p4, 1, 0 }
   0xc   : > { %s1092_s18 = scalar_select %p911_p6, 1, 0 }
   0xd   : > { %p916_p8 = pnand %p592_p5, %p99_p7  ;;  %s111_s21 = sshll.u32 %s848_s20, 4  ;;  %s920_s21 = int_to_ptr.vmem [resolvable:$true] %s111_s21 }
   0xe   : > { %s932_s23 = sadd.s32 1, %s846_s0   ;;  %s28_s24 = sadd.s32 1, %s842_s14 }
   0xf   : > { %s1093_s19 = scalar_select %p916_p8, 1, 0 }
  0x10   : > { %p660_p9 = pneg %p916_p8  ;;  %s25_s25 = ssub.s32 %s846_s0, %s932_s23 }
  0x11   : > { %s718_s28 = scalar_lea.hbm %s1086_s2, 1536 }
  0x12   : > { %p927_p11 = pnand %p660_p9, %p1088_p1  ;;  %p719_p12 = scmp.ne.s32.totalorder %s1086_s2, %s718_s28 }
  0x13   : > { %p725_p5 = scmp.lt.u32.totalorder %s718_s28, %s1086_s2 }
  0x14   : > { %p720_p13 = pneg %p927_p11 }
  0x16   : > { %p721_p0 = pnand %p720_p13, %p719_p12 }
  0x18   : > { %p722_p3 = pneg %p721_p0 }
  0x1a   : > { %p727_p7 = pnand %p725_p5, %p722_p3 }
  0x1c   : > { %730 = shalt.err (!%p727_p7)
}
  0x1d   : > { %s731_s6 = scalar_lea.vmem %s920_s21, 1536  ;;  %p739_p2 = scmp.lt.s32.totalorder %s920_s21, %s920_s21 }
  0x1e   : > { %p732_p9 = scmp.ne.s32.totalorder %s920_s21, %s731_s6  ;;  %p740_p6 = scmp.lt.s32.totalorder %s731_s6, %s731_s6 }
  0x20   : > { %p734_p10 = pnand %p732_p9, %p720_p13  ;;  %p741_p4 = por %p740_p6, %p739_p2 }
  0x22   : > { %p735_p1 = pneg %p734_p10 }
  0x24   : > { %p742_p8 = pnand %p741_p4, %p735_p1 }
  0x26   : > { %745 = shalt.err (!%p742_p8)
}
  0x27   : > { %s849_s7 = smov 384   ;;  %s850_s8 = smov 24  }
  0x28   : > { %663 = dma.hbm_to_vmem [thread:$0]  (!%p927_p11), %s1086_s2, 1536, %s920_s21, [#allocation8], %s849_s7, %s849_s7, %s850_s8  }
  0x29   : > { %p26_p2 = scmp.eq.s32.totalorder %s25_s25, 0  ;;  %p35_p1 = scmp.ne.s32.totalorder %s842_s14, %s838_s13 }
  0x2a   : > { %p36_p4 = scmp.eq.s32.totalorder %s846_s0, 0  ;;  %p673_p6 = scmp.lt.s32.totalorder %s846_s0, 2 }
  0x2b   : > { %s963_s11 = scalar_select %p26_p2, %s842_s14, %s28_s24  }
  0x2c   : > { %p37_p8 = por %p36_p4, %p35_p1  ;;  %p1095_p10 = scmp.eq.s32.totalorder %s897_s15, 1 }
  0x2d   : > { %s125_s20 = sand.u32 1, %s842_s14   ;;  %s596_s26 = sshll.u32 %s846_s0, 7 }
  0x2e   : > { %p967_p12 = por %p1095_p10, %p35_p1  ;;  %s595_s27 = sshll.u32 %s125_s20, 3 }
  0x2f   : > { %s976_s29 = scalar_lea.hbm %s1085_s1, %s596_s26  ;;  %s129_s21 = scalar_lea.vmem [#allocation4], %s595_s27 }
  0x30   : > { %s136_s24 = sshll.u32 %s129_s21, 4  ;;  %p978_p11 = pnand %p673_p6, %p37_p8  ;;  %s982_s24 = int_to_ptr.vmem [resolvable:$true] %s136_s24 }
  0x31   : > { %s126_s30 = scalar_lea.sflag [#allocation5], %s125_s20  ;;  %s746_s4 = scalar_lea.hbm %s976_s29, 128 }
  0x32   : > { %p747_p13 = scmp.ne.s32.totalorder %s976_s29, %s746_s4  ;;  %p748_p0 = pneg %p978_p11 }
  0x33   : > { %s751_s7 = scalar_lea.hbm %s1085_s1, 256  ;;  %p752_p7 = scmp.lt.u32.totalorder %s976_s29, %s1085_s1 }
  0x34   : > { %p749_p3 = pnand %p748_p0, %p747_p13  ;;  %p753_p9 = scmp.lt.u32.totalorder %s751_s7, %s746_s4 }
  0x35   : > { %p755_p1 = scmp.lt.u32.totalorder %s746_s4, %s976_s29 }
  0x36   : > { %p750_p5 = pneg %p749_p3  ;;  %p754_p2 = por %p753_p9, %p752_p7 }
  0x38   : > { %p756_p4 = por %p755_p1, %p754_p2 }
  0x3a   : > { %p757_p6 = pnand %p756_p4, %p750_p5 }
  0x3c   : > { %760 = shalt.err (!%p757_p6)
}
  0x3d   : > { %s761_s10 = scalar_lea.vmem %s982_s24, 128  ;;  %s851_s20 = smov [#allocation4]  }
  0x3e   : > { %p762_p8 = scmp.ne.s32.totalorder %s982_s24, %s761_s10  ;;  %s766_s26 = sshll.u32 %s851_s20, 4  ;;  %s767_s26 = int_to_ptr.vmem [resolvable:$false] %s766_s26 }
  0x3f   : > { %s768_s27 = scalar_lea.vmem %s767_s26, 256  ;;  %p769_p3 = scmp.lt.s32.totalorder %s982_s24, %s767_s26 }
  0x40   : > { %p764_p10 = pnand %p762_p8, %p748_p0  ;;  %p770_p7 = scmp.lt.s32.totalorder %s768_s27, %s761_s10 }
  0x42   : > { %p765_p13 = pneg %p764_p10  ;;  %p771_p9 = por %p770_p7, %p769_p3 }
  0x44   : > { %p772_p2 = pnand %p771_p9, %p765_p13 }
  0x46   : > { %775 = shalt.err (!%p772_p2)
}
  0x47   : > { %667 = dma.hbm_to_vmem [thread:$0]  (!%p978_p11), %s976_s29, 128, %s982_s24, %s126_s30  }
  0x48   : > { %p1098_p5 = scmp.ne.s32.totalorder %s1093_s19, 0 }
  0x49   : > { %s1012_s22 = sand.u32 (!%p1098_p5), 1, %s838_s13   ;;  %p1099_p0 = scmp.ne.s32.totalorder (!%p1098_p5), %s1091_s17, 0 }
  0x4a   : > { %145 = sbr.rel (%p1098_p5) target bundleno = 1064 (0x428), region = 28  ;;  %s598_s28 = sshll.u32 (!%p1098_p5), %s1012_s22, 3 }
  0x4b   : > { %s148_s21 = scalar_lea.sflag (!%p1098_p5), [#allocation5], %s1012_s22  ;;  %s151_s4 = scalar_lea.vmem (!%p1098_p5), [#allocation4], %s598_s28 }
  0x51   : > { %821 = dma.done.wait (%p1099_p0), %s148_s21, 128  }
  0x52   : > { %823 = vsyncadd (%p1099_p0), %s148_s21, 4294967168  ;;  %p1100_p11 = scmp.eq.s32.totalorder %s897_s15, 0 }
  0x54   : > { %825 = dma.done.wait (%p1100_p11), [#allocation8], 1536   ;;  %p1101_p1 = pmov %p1100_p11 }
  0x55   : > { %v852_v0 = vmov 0.0   ;;  %v178_v1 = vld [vmem:[#allocation7 + $0x8] sm:$0xff]  ;;  %v181_v2 = vld [vmem:[#allocation7 + $0x20] sm:$0xff]  ;;  %v180_v5 = vld [vmem:[#allocation7 + $0x18] sm:$0xff]  ;;  %vm189_vm0 = vcmask 261120   ;;  %vm853_vm1 = vmmov 0   ;;  %v405_v24 = vlaneseq }
  0x56   : > { %827 = vsyncadd (%p1101_p1), [#allocation8], 4294965760  ;;  %257 = vmatprep.mubr.f32.mxu0 %v852_v0  ;;  %v177_v3 = vld [vmem:[#allocation7] sm:$0xff]  ;;  %v638_v4 = vpack.c.bf16 %v181_v2, %v178_v1  ;;  %v184_v6 = vld [vmem:[#allocation7 + $0x38] sm:$0xff]  ;;  %625 = vmatprep.mubr.msk.f32.mxu1 %vm853_vm1, %v852_v0  ;;  %v854_v20 = vmov 0.0|0.0   ;;  %vm411_vm3 = vcmask 64512  }
  0x57   : > { %v187_v7 = vld [vmem:[#allocation7 + $0x50] sm:$0xff]  ;;  %v640_v8 = vpack.c.bf16 %v180_v5, %v177_v3  ;;  %v186_v11 = vld [vmem:[#allocation7 + $0x48] sm:$0xff]  ;;  %v185_v19 = vld [vmem:[#allocation7 + $0x40] sm:$0xff]  ;;  %646 = vmatprep.subr.bf16.mxu1 %v854_v20  ;;  %v406_v25 = vshrl.u32 %v405_v24, 7  ;;  %v408_v26 = vand.u32 127, %v405_v24  ;;  %s175_s17 = scalar_lea.vmem [#allocation9], %s598_s28 }
  0x58   : > { %v642_v9 = vpack.c.bf16 %v187_v7, %v184_v6  ;;  %v183_v10 = vld [vmem:[#allocation7 + $0x30] sm:$0xff]  ;;  %639 = vmatprep.subr.bf16.mxu0 %v638_v4  ;;  %v182_v18 = vld [vmem:[#allocation7 + $0x28] sm:$0xff]  ;;  %v188_v22 = vld [vmem:[#allocation7 + $0x58] sm:$0xff]  ;;  %s511_s19 = sshll.u32 %s175_s17, 4  ;;  %s605_s29 = sshll.u32 %s897_s15, 7  ;;  %s1037_s19 = int_to_ptr.vmem [resolvable:$true] %s511_s19 }
  0x59   : > { %641 = vmatpush1.bf16.msra.mxu0 %v640_v8  ;;  %v644_v12 = vpack.c.bf16 %v186_v11, %v183_v10  ;;  %v176_v13 = vld [vmem:[%s151_s4] sm:$0xff]  ;;  %v650_v23 = vpack.c.bf16 %v188_v22, %v185_v19  ;;  %vm409_vm2 = vcmp.le.s32.totalorder %v408_v26, %v406_v25  ;;  %s1042_s30 = scalar_lea.hbm %s1087_s3, %s605_s29  ;;  %s498_s5 = scalar_lea.sflag [#allocation6], %s1012_s22 }
  0x5a   : > { %643 = vmatprep.subr.bf16.mxu0 %v642_v9  ;;  %v179_v17 = vld [vmem:[#allocation7 + $0x10] sm:$0xff]  ;;  %s776_s6 = scalar_lea.vmem %s1037_s19, 128  ;;  %s855_s15 = smov [#allocation9]  }
  0x5b   : > { %v647_v21 = vpack.c.bf16 %v182_v18, %v179_v17  ;;  %p777_p4 = scmp.ne.s32.totalorder %s1037_s19, %s776_s6  ;;  %s780_s7 = sshll.u32 %s855_s15, 4  ;;  %s781_s7 = int_to_ptr.vmem [resolvable:$false] %s780_s7 }
  0x5c   : > { %s782_s8 = scalar_lea.vmem %s781_s7, 256  ;;  %p783_p10 = scmp.lt.s32.totalorder %s1037_s19, %s781_s7 }
  0x5d   : > { %645 = vmatpush1.bf16.msra.mxu0 %v644_v12  ;;  %648 = vmatpush3.bf16.msra.mxu1 %v647_v21  ;;  %p778_p6 = pnand %p777_p4, %p967_p12  ;;  %p784_p13 = scmp.lt.s32.totalorder %s782_s8, %s776_s6 }
  0x5e   : > { %628 = vmatprep.subr.mxu0 %v852_v0  ;;  %649 = vmatprep.subr.bf16.mxu1 %v854_v20 }
  0x5f   : > { %p779_p8 = pneg %p778_p6  ;;  %p785_p3 = por %p784_p13, %p783_p10 }
  0x60   : > { %601 = vmatmul.mubr.msk.f32.vlgmr.msra.gmra.mrb[0].mxu0 %vm189_vm0, %v176_v13 }
  0x61   : > { %630 = vmatprep.mubr.msk.f32.mxu0 %vm853_vm1, %v852_v0  ;;  %651 = vmatpush3.bf16.msra.mxu1 %v650_v23  ;;  %p786_p7 = pnand %p785_p3, %p779_p8 }
  0x62   : > { %633 = vmatprep.subr.mxu1 %v852_v0 }
  0x64   : > { %626 = vmatmul.mubr.msk.f32.vlgmr.msra.gmra.mrb[0].mxu1 %vm189_vm0, %v176_v13 }
  0x65   : > { %635 = vmatprep.mubr.msk.f32.mxu1 %vm853_vm1, %v852_v0 }
 0x133   : > { %v259_v14 = vpop.f32.mrb[0].mxu0 }
 0x134   : > { %v261_v15 = vpop.f32.mrb[1].mxu0  ;;  %629 = vmatpush3.xpose.msra.mxu0 %v259_v14 }
 0x135   : > { %v334_v16 = vmul.f32 0.17677669, %v261_v15 }
 0x137   : > { %631 = vmatmul.mubr.f32.vlgmr.msra.gmra.mrb[2].mxu0 %v334_v16  ;;  %v330_v36 = vpop.f32.mrb[0].mxu1 }
 0x138   : > { %v627_v37 = vpop.f32.mrb[1].mxu1  ;;  %634 = vmatpush3.msra.mxu1 %v330_v36 }
 0x20a   : > { %v401_v27 = vpop.f32.mrb[2].mxu0 }
 0x20b   : > { %v410_v28 = vsel %vm409_vm2, %v401_v27, -1e+30  ;;  %v632_v29 = vpop.f32.mrb[3].mxu0 }
 0x20c   : > { %v412_v30 = vsel %vm411_vm3, %v410_v28, -inf }
 0x20d   : > { %413 = vmax.xlane.f32.xlu0 %v412_v30 }
 0x29a   : > { %v414_v31 = vpop.xlane.xlu0 %413 }
 0x29b   : > { %v415_v32 = vsub.f32 %v410_v28, %v414_v31 }
 0x29d   : > { %v416_v33 = vmul.f32 1.442695, %v415_v32 }
 0x29f   : > { %714 = vpow2.f32 %v416_v33 }
 0x2a9   : > { %v715_v34 = vpop.eup %714 }
 0x2aa   : > { %v418_v35 = vsel %vm411_vm3, %v715_v34, 0.0 }
 0x2ab   : > { %419 = vadd.xlane.f32.xlu0 %v418_v35 }
 0x338   : > { %v420_v38 = vpop.xlane.xlu0 %419 }
 0x339   : > { %716 = vrcp.f32 %v420_v38 }
 0x343   : > { %v717_v39 = vpop.eup %716 }
 0x344   : > { %v422_v40 = vmul.f32 %v717_v39, %v715_v34 }
 0x346   : > { %636 = vmatmul.mubr.msk.f32.vlgmr.msra.gmra.mrb[2].mxu1 %vm411_vm3, %v422_v40 }
 0x419   : > { %v492_v41 = vpop.f32.mrb[2].mxu1 }
 0x41a   : > { %496 = vst [vmem:[%s175_s17] sm:$0xff] %v492_v41  ;;  %v637_v42 = vpop.f32.mrb[3].mxu1 }
 0x41b   : > { %789 = shalt.err (!%p786_p7)
}
 0x41c   : > { %s790_s9 = scalar_lea.hbm %s1042_s30, 128  ;;  %s794_s26 = scalar_lea.hbm %s1087_s3, 256 }
 0x41d   : > { %p791_p9 = scmp.ne.s32.totalorder %s1042_s30, %s790_s9  ;;  %p795_p0 = scmp.lt.u32.totalorder %s1042_s30, %s1087_s3 }
 0x41e   : > { %p796_p11 = scmp.lt.u32.totalorder %s794_s26, %s790_s9  ;;  %p798_p4 = scmp.lt.u32.totalorder %s790_s9, %s1042_s30 }
 0x41f   : > { %p792_p2 = pnand %p791_p9, %p967_p12 }
 0x420   : > { %p797_p1 = por %p796_p11, %p795_p0 }
 0x421   : > { %p793_p5 = pneg %p792_p2 }
 0x422   : > { %p799_p6 = por %p798_p4, %p797_p1 }
 0x424   : > { %p800_p8 = pnand %p799_p6, %p793_p5 }
 0x426   : > { %803 = shalt.err (!%p800_p8)
}
 0x427   : > { %658 = dma.vmem_to_hbm [thread:$0]  (%p967_p12), %s1037_s19, 128, %s1042_s30, %s498_s5  }
 0x428 PF: > { %s523_s28 = sand.u32 1, %s834_s12   ;;  %p1102_p10 = scmp.ne.s32.totalorder %s1092_s18, 0 }
 0x429   : > { %p1103_p13 = scmp.ge.s32.totalorder %s846_s0, 2  ;;  %s524_s21 = scalar_lea.sflag [#allocation6], %s523_s28 }
 0x42b   : > { %p669_p3 = pnand %p1103_p13, %p1102_p10 }
 0x42d   : > { %829 = dma.done.wait (!%p669_p3), %s524_s21, 128  }
 0x42e   : > { %831 = vsyncadd (!%p669_p3), %s524_s21, 4294967168  ;;  %p18_p7 = scmp.ge.s32.totalorder %s932_s23, 4   ;;  %s1104_s12 = smov %s838_s13 }
 0x42f   : > { %s1105_s13 = smov %s842_s14  ;;  %s1106_s14 = smov %s963_s11 }
 0x430   : > { %s1107_s0 = smov %s932_s23  ;;  %20 = sbr.rel (!%p18_p7) target bundleno = 6 (0x6), region = 77 }
 0x437   :  { %529 = vsyncpa [#allocation5], 1 }
 0x438   :  { %531 = vsyncpa [#allocation5 + $0x1], 1 }
 0x439   :  { %532 = vsyncpa [#allocation8], 1 }
 0x43a   :  { %533 = vsyncpa [#allocation6], 1 }
 0x43b   :  { %535 = vsyncpa [#allocation6 + $0x1], 1 }

</bundles_post_ra>
